<compile_context>
chip_gen: v7x
topology: tpu7x:2x2x1
jax: 0.10.0
libtpu: 0.0.40
codegen_flags: <defaults>
</compile_context>

<pallas_src>
import math

import jax
import jax.numpy as jnp
from jax.experimental import pallas as pl
from jax.experimental.pallas import tpu as pltpu


def _se_kernel(x_ref, wr_ref, br_ref, we_ref, be_ref, o_ref):
    # x_ref : (Bn, C, HW)  batch block; channels on sublanes, spatial on lanes
    # wr_ref: (S, C)  br_ref: (S, 1)   -- se_reduce 1x1 conv
    # we_ref: (C, S)  be_ref: (C, 1)   -- se_expand 1x1 conv
    x = x_ref[...]                                                    # (Bn, C, HW)
    inv_hw = 1.0 / float(x.shape[-1])

    # ---- AdaptiveAvgPool2d((1,1)): lane (XLU) reduce over the spatial axis ----
    pooled = jnp.sum(x, axis=-1, keepdims=True) * inv_hw              # (Bn, C, 1)

    # ---- se_reduce (1x1 conv, bias=True) + Swish ----
    h = jnp.einsum('sc,bcx->bsx', wr_ref[...], pooled,
                   preferred_element_type=jnp.float32) + br_ref[...]  # (Bn, S, 1)
    h = h * jax.nn.sigmoid(h)                                         # Swish
    # TODO(synk): the signal_preserving Swish variant is not defined in the
    # reference snippet; standard swish (default signal_preserving=False) used.

    # ---- se_expand (1x1 conv, bias=True) + sigmoid gate ----
    g = jax.nn.sigmoid(
        jnp.einsum('cs,bsx->bcx', we_ref[...], h,
                   preferred_element_type=jnp.float32) + be_ref[...]) # (Bn, C, 1)

    # ---- se_scaled_mult: x * g / clamp(sqrt((1-g)^2 + g^2), 1e-5) ----
    wn = jnp.maximum(jnp.sqrt((1.0 - g) ** 2 + g ** 2), 1e-5)         # (Bn, C, 1)
    o_ref[...] = x * (g / wn)                                         # (Bn, C, HW)


def squeeze_and_excite(x_nchw, params):
    """Forward pass of SqueezeAndExcite. Input/output are NCHW (PyTorch layout)."""
    N, C, H, W = x_nchw.shape
    HW = H * W
    S = params['w_reduce'].shape[0]
    x = x_nchw.reshape(N, C, HW).astype(jnp.float32)   # free reshape, no transpose

    # Batch rows per grid step: amortize the ~0.35us per-step overhead while
    # keeping the x block (double-buffered, in + out) comfortably inside VMEM.
    bytes_per_row = C * HW * 4
    Bn = max(1, min(N, (2 * 1024 * 1024) // max(bytes_per_row, 1)))
    grid = (pl.cdiv(N, Bn),)

    out = pl.pallas_call(
        _se_kernel,
        out_shape=jax.ShapeDtypeStruct((N, C, HW), jnp.float32),
        grid_spec=pltpu.PrefetchScalarGridSpec(
            num_scalar_prefetch=0,
            grid=grid,
            in_specs=[
                pl.BlockSpec((Bn, C, HW), lambda n: (n, 0, 0)),  # x batch block
                pl.BlockSpec((S, C), lambda n: (0, 0)),          # w_reduce (resident)
                pl.BlockSpec((S, 1), lambda n: (0, 0)),          # b_reduce
                pl.BlockSpec((C, S), lambda n: (0, 0)),          # w_expand
                pl.BlockSpec((C, 1), lambda n: (0, 0)),          # b_expand
            ],
            out_specs=pl.BlockSpec((Bn, C, HW), lambda n: (n, 0, 0)),
        ),
        compiler_params=pltpu.CompilerParams(
            dimension_semantics=("parallel",)),                  # megacore on v7x
    )(x, params['w_reduce'], params['b_reduce'],
      params['w_expand'], params['b_expand'])

    return out.reshape(N, C, H, W)


def init_params(key, channels, squeeze_channels, se_ratio):
    sq = squeeze_channels * se_ratio
    if not float(sq).is_integer():
        raise ValueError('channels must be divisible by 1/ratio')
    S = int(sq)
    ks = jax.random.split(key, 4)
    n = lambda k, shape, sc: sc * jax.random.normal(k, shape, jnp.float32)
    p = {}
    # PyTorch Conv2d weight layout (out_ch, in_ch); biases stored as columns.
    p['w_reduce'] = n(ks[0], (S, channels), 1.0 / math.sqrt(channels))
    p['b_reduce'] = n(ks[1], (S, 1), 1.0 / math.sqrt(channels))
    p['w_expand'] = n(ks[2], (channels, S), 1.0 / math.sqrt(max(S, 1)))
    p['b_expand'] = n(ks[3], (channels, 1), 1.0 / math.sqrt(max(S, 1)))
    return p


def se_ref(x_nchw, params):
    """Pure-JAX reference with identical semantics (for numerical checking)."""
    x = x_nchw.astype(jnp.float32)
    pooled = jnp.mean(x, axis=(2, 3))                                # (N, C)
    h = pooled @ params['w_reduce'].T + params['b_reduce'][:, 0]     # (N, S)
    h = h * jax.nn.sigmoid(h)                                        # Swish
    g = jax.nn.sigmoid(h @ params['w_expand'].T + params['b_expand'][:, 0])  # (N, C)
    wn = jnp.maximum(jnp.sqrt((1.0 - g) ** 2 + g ** 2), 1e-5)
    return x * (g / wn)[:, :, None, None]


if __name__ == "__main__":
    # SqueezeAndExcite(channels=32, squeeze_channels=32, se_ratio=0.25) -> S=8
    channels, squeeze_channels, se_ratio = 32, 32, 0.25
    N, H, W = 2, 16, 16

    key = jax.random.PRNGKey(0)
    kx, kp = jax.random.split(key)
    x = jax.random.normal(kx, (N, channels, H, W), jnp.float32)   # NCHW like PyTorch
    params = init_params(kp, channels, squeeze_channels, se_ratio)

    y = squeeze_and_excite(x, params)
    y = jax.block_until_ready(y)

    y_ref = se_ref(x, params)
    assert y.shape == (N, channels, H, W), y.shape
    assert jnp.allclose(y, y_ref, rtol=1e-4, atol=1e-4), \
        float(jnp.max(jnp.abs(y - y_ref)))
    print("KERNEL_OK")
</pallas_src>

<mosaic_0001>
module attributes {stable_mosaic.version = 11 : i64} {
  func.func @_se_kernel(%arg0: i32, %arg1: memref<2x32x256xf32, #tpu.memory_space<vmem>>, %arg2: memref<8x32xf32, #tpu.memory_space<vmem>>, %arg3: memref<8x1xf32, #tpu.memory_space<vmem>>, %arg4: memref<32x8xf32, #tpu.memory_space<vmem>>, %arg5: memref<32x1xf32, #tpu.memory_space<vmem>>, %arg6: memref<2x32x256xf32, #tpu.memory_space<vmem>>) attributes {dimension_semantics = [#tpu.dimension_semantics<parallel>], iteration_bounds = array<i64: 1>, scalar_prefetch = 0 : i64, scratch_operands = 0 : i64, tpu.core_type = #tpu.core_type<tc>, window_params = [{transform_indices = @transform_0, window_bounds = array<i64: 2, 32, 256>}, {pipeline_mode = #tpu.pipeline_mode<synchronous>, transform_indices = @transform_1, window_bounds = array<i64: 8, 32>}, {pipeline_mode = #tpu.pipeline_mode<synchronous>, transform_indices = @transform_2, window_bounds = array<i64: 8, 1>}, {pipeline_mode = #tpu.pipeline_mode<synchronous>, transform_indices = @transform_3, window_bounds = array<i64: 32, 8>}, {pipeline_mode = #tpu.pipeline_mode<synchronous>, transform_indices = @transform_4, window_bounds = array<i64: 32, 1>}, {transform_indices = @transform_5, window_bounds = array<i64: 2, 32, 256>}]} {
    %c0 = arith.constant 0 : index
    %c0_0 = arith.constant 0 : index
    %c0_1 = arith.constant 0 : index
    %0 = vector.load %arg1[%c0, %c0_0, %c0_1] : memref<2x32x256xf32, #tpu.memory_space<vmem>>, vector<2x32x256xf32>
    %cst = arith.constant dense<0.000000e+00> : vector<2x32xf32>
    %1 = vector.multi_reduction <add>, %0, %cst [2] : vector<2x32x256xf32> to vector<2x32xf32>
    %2 = vector.shape_cast %1 : vector<2x32xf32> to vector<2x32x1xf32>
    %cst_2 = arith.constant 3.906250e-03 : f32
    %3 = vector.broadcast %cst_2 : f32 to vector<2x32x1xf32>
    %4 = arith.mulf %2, %3 : vector<2x32x1xf32>
    %c0_3 = arith.constant 0 : index
    %c0_4 = arith.constant 0 : index
    %5 = vector.load %arg2[%c0_3, %c0_4] : memref<8x32xf32, #tpu.memory_space<vmem>>, vector<8x32xf32>
    "tpu.trace_start"() <{level = 10 : i32, message = "sc,bcx->bsx"}> : () -> ()
    %cst_5 = arith.constant dense<0.000000e+00> : vector<2x1x8xf32>
    %6 = tpu.matmul %4, %5, %cst_5 {dimension_numbers = #tpu.dot_dimension_numbers<[1], [1], [0, 2], [0], [0, 0, 0, 2, 1, 0], [], []>} : vector<2x32x1xf32>, vector<8x32xf32>, vector<2x1x8xf32> -> vector<2x1x8xf32>
    %7 = tpu.transpose %6, [0, 2, 1] : vector<2x1x8xf32> -> vector<2x8x1xf32>
    "tpu.trace_stop"() : () -> ()
    %c0_6 = arith.constant 0 : index
    %c0_7 = arith.constant 0 : index
    %8 = vector.load %arg3[%c0_6, %c0_7] : memref<8x1xf32, #tpu.memory_space<vmem>>, vector<8x1xf32>
    %9 = vector.shape_cast %8 : vector<8x1xf32> to vector<1x8x1xf32>
    %10 = vector.broadcast %9 : vector<1x8x1xf32> to vector<2x8x1xf32>
    %11 = arith.addf %7, %10 : vector<2x8x1xf32>
    %12 = arith.negf %11 : vector<2x8x1xf32>
    %13 = math.exp %12 : vector<2x8x1xf32>
    %cst_8 = arith.constant 1.000000e+00 : f32
    %14 = vector.broadcast %cst_8 : f32 to vector<2x8x1xf32>
    %15 = arith.addf %14, %13 : vector<2x8x1xf32>
    %16 = arith.divf %14, %15 : vector<2x8x1xf32>
    %17 = arith.mulf %11, %16 : vector<2x8x1xf32>
    %c0_9 = arith.constant 0 : index
    %c0_10 = arith.constant 0 : index
    %18 = vector.load %arg4[%c0_9, %c0_10] : memref<32x8xf32, #tpu.memory_space<vmem>>, vector<32x8xf32>
    "tpu.trace_start"() <{level = 10 : i32, message = "cs,bsx->bcx"}> : () -> ()
    %cst_11 = arith.constant dense<0.000000e+00> : vector<2x1x32xf32>
    %19 = tpu.matmul %17, %18, %cst_11 {dimension_numbers = #tpu.dot_dimension_numbers<[1], [1], [0, 2], [0], [0, 0, 0, 2, 1, 0], [], []>} : vector<2x8x1xf32>, vector<32x8xf32>, vector<2x1x32xf32> -> vector<2x1x32xf32>
    %20 = tpu.transpose %19, [0, 2, 1] : vector<2x1x32xf32> -> vector<2x32x1xf32>
    "tpu.trace_stop"() : () -> ()
    %c0_12 = arith.constant 0 : index
    %c0_13 = arith.constant 0 : index
    %21 = vector.load %arg5[%c0_12, %c0_13] : memref<32x1xf32, #tpu.memory_space<vmem>>, vector<32x1xf32>
    %22 = vector.shape_cast %21 : vector<32x1xf32> to vector<1x32x1xf32>
    %23 = vector.broadcast %22 : vector<1x32x1xf32> to vector<2x32x1xf32>
    %24 = arith.addf %20, %23 : vector<2x32x1xf32>
    %25 = arith.negf %24 : vector<2x32x1xf32>
    %26 = math.exp %25 : vector<2x32x1xf32>
    %cst_14 = arith.constant 1.000000e+00 : f32
    %27 = vector.broadcast %cst_14 : f32 to vector<2x32x1xf32>
    %28 = arith.addf %27, %26 : vector<2x32x1xf32>
    %29 = arith.divf %27, %28 : vector<2x32x1xf32>
    %cst_15 = arith.constant 1.000000e+00 : f32
    %30 = vector.broadcast %cst_15 : f32 to vector<2x32x1xf32>
    %31 = arith.subf %30, %29 : vector<2x32x1xf32>
    %32 = arith.mulf %31, %31 : vector<2x32x1xf32>
    %33 = arith.mulf %29, %29 : vector<2x32x1xf32>
    %34 = arith.addf %32, %33 : vector<2x32x1xf32>
    %35 = math.sqrt %34 : vector<2x32x1xf32>
    %cst_16 = arith.constant 9.99999974E-6 : f32
    %36 = vector.broadcast %cst_16 : f32 to vector<2x32x1xf32>
    %37 = arith.maximumf %35, %36 : vector<2x32x1xf32>
    %38 = arith.divf %29, %37 : vector<2x32x1xf32>
    %39 = vector.broadcast %38 : vector<2x32x1xf32> to vector<2x32x256xf32>
    %40 = arith.mulf %0, %39 : vector<2x32x256xf32>
    %c0_17 = arith.constant 0 : index
    %c0_18 = arith.constant 0 : index
    %c0_19 = arith.constant 0 : index
    %41 = vector.load %arg6[%c0_17, %c0_18, %c0_19] : memref<2x32x256xf32, #tpu.memory_space<vmem>>, vector<2x32x256xf32>
    tpu.vector_store %arg6[%c0_17, %c0_18, %c0_19], %40 {strides = array<i32>} : memref<2x32x256xf32, #tpu.memory_space<vmem>>, vector<2x32x256xf32>,
    return
  }
  func.func @transform_0(%arg0: i32) -> (i32, i32, i32) {
    %c0_i32 = arith.constant 0 : i32
    %c0_i32_0 = arith.constant 0 : i32
    %c0_i32_1 = arith.constant 0 : i32
    return %arg0, %c0_i32, %c0_i32_0 : i32, i32, i32
  }
  func.func @transform_1(%arg0: i32) -> (i32, i32) {
    %c0_i32 = arith.constant 0 : i32
    %c0_i32_0 = arith.constant 0 : i32
    %c0_i32_1 = arith.constant 0 : i32
    return %c0_i32, %c0_i32_0 : i32, i32
  }
  func.func @transform_2(%arg0: i32) -> (i32, i32) {
    %c0_i32 = arith.constant 0 : i32
    %c0_i32_0 = arith.constant 0 : i32
    %c0_i32_1 = arith.constant 0 : i32
    return %c0_i32, %c0_i32_0 : i32, i32
  }
  func.func @transform_3(%arg0: i32) -> (i32, i32) {
    %c0_i32 = arith.constant 0 : i32
    %c0_i32_0 = arith.constant 0 : i32
    %c0_i32_1 = arith.constant 0 : i32
    return %c0_i32, %c0_i32_0 : i32, i32
  }
  func.func @transform_4(%arg0: i32) -> (i32, i32) {
    %c0_i32 = arith.constant 0 : i32
    %c0_i32_0 = arith.constant 0 : i32
    %c0_i32_1 = arith.constant 0 : i32
    return %c0_i32, %c0_i32_0 : i32, i32
  }
  func.func @transform_5(%arg0: i32) -> (i32, i32, i32) {
    %c0_i32 = arith.constant 0 : i32
    %c0_i32_0 = arith.constant 0 : i32
    %c0_i32_1 = arith.constant 0 : i32
    return %arg0, %c0_i32, %c0_i32_0 : i32, i32, i32
  }
}

</mosaic_0001>

<bundles_post_ra>
// kernel: tpu_custom_call.1
= control target key start
LH: loop header
LB: loop body
LE: loop exit
PB: predicated region body
PF: predicated region fallthrough
CT: control target
= control target key end

     0   :  { %10 = vsyncpa [#allocation3], 0  ;;  %s1286_s0 = inlined_call_operand.hbm [shape: f32[2,32,256], index: 0, kind: input, shape index: {}]   ;;  %s1287_s1 = inlined_call_operand.vmem [shape: f32[8,32], index: 1, kind: input, shape index: {}]   ;;  %s1288_s2 = inlined_call_operand.vmem [shape: f32[8,1], index: 2, kind: input, shape index: {}]   ;;  %s1289_s3 = inlined_call_operand.vmem [shape: f32[32,8], index: 3, kind: input, shape index: {}]   ;;  %s1290_s4 = inlined_call_operand.vmem [shape: f32[32,1], index: 4, kind: input, shape index: {}]   ;;  %s1291_s5 = inlined_call_operand.hbm [shape: f32[2,32,256], index: 5, kind: output, shape index: {}]  }
   0x1   :  { %11 = vsyncpa [#allocation4], 0  ;;  %s1021_s18 = smov [#allocation2]   ;;  %s973_s22 = scalar_lea.hbm %s1286_s0, 2048 }
   0x2   :  { %s17_s19 = sshll.u32 %s1021_s18, 4  ;;  %p974_p0 = scmp.ne.s32.totalorder %s1286_s0, %s973_s22  ;;  %s18_s19 = int_to_ptr.vmem [resolvable:$true] %s17_s19 }
   0x3   :  { %p977_p1 = scmp.lt.u32.totalorder %s973_s22, %s1286_s0 }
   0x5   :  { %p979_p2 = pnand %p977_p1, %p974_p0 }
   0x7   :  { %982 = shalt.err (!%p979_p2)
}
   0x8   :  { %s983_s27 = scalar_lea.vmem %s18_s19, 2048  ;;  %p988_p4 = scmp.lt.s32.totalorder %s18_s19, %s18_s19 }
   0x9   :  { %p984_p3 = scmp.ne.s32.totalorder %s18_s19, %s983_s27  ;;  %p989_p5 = scmp.lt.s32.totalorder %s983_s27, %s983_s27 }
   0xb   :  { %p990_p6 = por %p989_p5, %p988_p4 }
   0xd   :  { %p991_p7 = pnand %p990_p6, %p984_p3 }
   0xf   :  { %994 = shalt.err (!%p991_p7)
}
  0x10   :  { %s1022_s28 = smov 256   ;;  %s1023_s29 = smov 16  }
  0x11   :  { %23 = dma.hbm_to_vmem [thread:$0]  %s1286_s0, 2048, %s18_s19, [#allocation3], %s1022_s28, %s1022_s28, %s1023_s29  }
  0x12   :  { %1017 = dma.done.wait [#allocation3], 2048  }
  0x13   :  { %1018 = vsyncadd [#allocation3], 4294965248  ;;  %v1075_v0 = vld [vmem:[#allocation2 + $0x40] sm:$0xff]  ;;  %v1077_v1 = vld [vmem:[#allocation2 + $0x48] sm:$0xff]  ;;  %v1024_v24 = vmov 0.0   ;;  %vm153_vm0 = vcmask 261120   ;;  %v233_v48 = vlaneseq }
  0x14   :  { %v1079_v2 = vld [vmem:[#allocation2 + $0x50] sm:$0xff]  ;;  %v63_v3 = vadd.f32 %v1077_v1, %v1075_v0  ;;  %v1083_v4 = vld [vmem:[#allocation2 + $0x58] sm:$0xff]  ;;  %v1085_v5 = vld [vmem:[#allocation2] sm:$0xff]  ;;  %866 = vmatprep.subr.mxu0 %v1024_v24  ;;  %vm1025_vm1 = vmmov 0   ;;  %vm151_vm2 = vcmask 1041409   ;;  %vm407_vm3 = vcmask 64512  }
  0x15   :  { %v1087_v6 = vld [vmem:[#allocation2 + $0x8] sm:$0xff]  ;;  %v66_v7 = vadd.f32 %v1083_v4, %v1079_v2  ;;  %v1091_v8 = vld [vmem:[#allocation2 + $0x10] sm:$0xff]  ;;  %v1093_v9 = vld [vmem:[#allocation2 + $0x18] sm:$0xff]  ;;  %868 = vmatprep.mubr.msk.f32.mxu0 %vm1025_vm1, %v1024_v24  ;;  %879 = vmatprep.mubr.msk.f32.mxu1 %vm1025_vm1, %v1024_v24  ;;  %v1026_v46 = vmov 1966171168   ;;  %v234_v50 = vshrl.u32 %v233_v48, 7 }
  0x16   :  { %64 = vadd.xlane.f32.xlu0 %v63_v3  ;;  %v51_v10 = vadd.f32 %v1087_v6, %v1085_v5  ;;  %v54_v11 = vadd.f32 %v1093_v9, %v1091_v8  ;;  %v1099_v12 = vld [vmem:[#allocation2 + $0x60] sm:$0xff]  ;;  %v1101_v13 = vld [vmem:[#allocation2 + $0x68] sm:$0xff]  ;;  %v1111_v18 = vld [vmem:[#allocation2 + $0x70] sm:$0xff]  ;;  %v231_v47 = vunpack.c.l.s4 %v1026_v46  ;;  %v1027_v60 = vmov 0.0|0.0  }
  0x17   :  { %67 = vadd.xlane.f32.xlu1 %v66_v7  ;;  %v1103_v14 = vld [vmem:[#allocation2 + $0x20] sm:$0xff]  ;;  %v1105_v15 = vld [vmem:[#allocation2 + $0x28] sm:$0xff]  ;;  %v69_v16 = vadd.f32 %v1101_v13, %v1099_v12  ;;  %v1113_v19 = vld [vmem:[#allocation2 + $0x78] sm:$0xff]  ;;  %882 = vmatprep.subr.bf16.mxu1 %v1027_v60 }
  0x18   :  { %v57_v17 = vadd.f32 %v1105_v15, %v1103_v14  ;;  %v1115_v20 = vld [vmem:[#allocation2 + $0x30] sm:$0xff]  ;;  %v1117_v21 = vld [vmem:[#allocation2 + $0x38] sm:$0xff]  ;;  %v72_v22 = vadd.f32 %v1113_v19, %v1111_v18  ;;  %v83_v30 = vld [vmem:[%s1287_s1] sm:$0xff]  ;;  %v232_v49 = vunpack.c.0.s8 %v231_v47 }
  0x19   :  { %v60_v23 = vadd.f32 %v1117_v21, %v1115_v20  ;;  %867 = vmatpush3.xpose.msk.msra.mxu0 %vm153_vm0, %v83_v30  ;;  %v335_v58 = vld [vmem:[%s1289_s3] sm:$0xff]  ;;  %v336_v59 = vld [vmem:[%s1289_s3 + $0x8] sm:$0xff]  ;;  %vm884_vm4 = vmpackc.low %vm407_vm3, %vm407_vm3 }
  0x1a   :  { %52 = vadd.xlane.f32.xlu0 %v51_v10  ;;  %v235_v51 = vsub.s32 %v232_v49, %v234_v50  ;;  %v883_v61 = vpack.c.bf16 %v336_v59, %v335_v58  ;;  %v337_v62 = vld [vmem:[%s1289_s3 + $0x10] sm:$0xff]  ;;  %v338_v63 = vld [vmem:[%s1289_s3 + $0x18] sm:$0xff]  ;;  %v318_v7 = vld [vmem:[%s1288_s2] sm:$0xff] }
  0x1b   :  { %55 = vadd.xlane.f32.xlu1 %v54_v11  ;;  %v887_v3 = vpack.c.bf16 %v338_v63, %v337_v62  ;;  %v582_v47 = vld [vmem:[%s1290_s4 + $0x8] sm:$0xff] }
  0x1c   :  { %885 = vmatpush3.bf16.xpose.msk.msra.mxu1 %vm884_vm4, %v883_v61  ;;  %v584_v61 = vld [vmem:[%s1290_s4 + $0x18] sm:$0xff] }
  0x1d   :  { %886 = vmatprep.subr.bf16.mxu1 %v1027_v60 }
  0x1e   :  { %70 = vadd.xlane.f32.xlu0 %v69_v16 }
  0x1f   :  { %58 = vadd.xlane.f32.xlu1 %v57_v17 }
  0x22   :  { %73 = vadd.xlane.f32.xlu0 %v72_v22 }
  0x23   :  { %61 = vadd.xlane.f32.xlu1 %v60_v23 }
  0x24   :  { %889 = vmatpush3.bf16.xpose.msk.msra.mxu1 %vm884_vm4, %v887_v3 }
  0xa3   :  { %v65_v25 = vpop.xlane.xlu0 %64 }
  0xa4   :  { %v79_v26 = vmul.f32 0.00390625, %v65_v25  ;;  %v68_v27 = vpop.xlane.xlu1 %67 }
  0xa5   :  { %v80_v28 = vmul.f32 0.00390625, %v68_v27 }
  0xa6   :  { %116 = vxpose.xlu0.b32.start [1/4] (short) (narrow) %v79_v26, 8 }
  0xa7   :  { %v53_v29 = vpop.xlane.xlu0 %52 }
  0xa8   :  { %v75_v31 = vmul.f32 0.00390625, %v53_v29  ;;  %v56_v32 = vpop.xlane.xlu1 %55 }
  0xa9   :  { %v76_v33 = vmul.f32 0.00390625, %v56_v32 }
  0xaa   :  { %117 = vxpose.xlu0.b32.cont [2/4] (short) (narrow) %v80_v28, 8  ;;  %84 = vxpose.xlu1.b32.start [1/4] (short) (narrow) %v75_v31, 8 }
  0xab   :  { %v71_v34 = vpop.xlane.xlu0 %70 }
  0xac   :  { %v81_v35 = vmul.f32 0.00390625, %v71_v34  ;;  %v59_v36 = vpop.xlane.xlu1 %58 }
  0xad   :  { %v77_v37 = vmul.f32 0.00390625, %v59_v36 }
  0xae   :  { %85 = vxpose.xlu1.b32.cont [2/4] (short) (narrow) %v76_v33, 8  ;;  %118 = vxpose.xlu0.b32.cont [3/4] (short) (narrow) %v81_v35, 8 }
  0xaf   :  { %v74_v38 = vpop.xlane.xlu0 %73 }
  0xb0   :  { %v82_v39 = vmul.f32 0.00390625, %v74_v38  ;;  %v62_v40 = vpop.xlane.xlu1 %61 }
  0xb1   :  { %v78_v41 = vmul.f32 0.00390625, %v62_v40 }
  0xb2   :  { %86 = vxpose.xlu1.b32.cont [3/4] (short) (narrow) %v77_v37, 8  ;;  %119 = vxpose.xlu0.b32.end [4/4] (short) (narrow) %v82_v39, 8 }
  0xb6   :  { %87 = vxpose.xlu1.b32.end [4/4] (short) (narrow) %v78_v41, 8 }
 0x126   :  { %v132_v42 = vpop.trf.xlu0 }
 0x127   :  { %v150_v43 = vrot.slane %v132_v42, 7  ;;  %v1028_v42 = vmov 0  }
 0x12a   :  { %v100_v44 = vpop.trf.xlu1 }
 0x12b   :  { %v152_v45 = vsel %vm151_vm2, %v150_v43, %v100_v44  ;;  %v581_v43 = vld [vmem:[%s1290_s4] sm:$0xff] }
 0x12c   :  { %869 = vmatmul.mubr.msk.f32.vlgmr.msra.gmra.mrb[0].mxu0 %vm153_vm0, %v152_v45 }
 0x1ff   :  { %v225_v52 = vpop.f32.mrb[0].mxu0 }
 0x200   :  { %v236_v53 = vrot.slane %v225_v52, %v235_v51  ;;  %v870_v54 = vpop.f32.mrb[1].mxu0 }
 0x201   :  { %v583_v54 = vld [vmem:[%s1290_s4 + $0x10] sm:$0xff]  ;;  %s1029_s4 = smov [#allocation5]  }
 0x202   :  { %v237_v55 = vcombine.high %v236_v53, %v236_v53  ;;  %v244_v57 = vrot.slane %v236_v53, %v235_v51  ;;  %s830_s23 = sshll.u32 %s1029_s4, 4  ;;  %s831_s23 = int_to_ptr.vmem [resolvable:$true] %s830_s23 }
 0x203   :  { %s995_s24 = scalar_lea.vmem %s831_s23, 2048  ;;  %p1000_p9 = scmp.lt.s32.totalorder %s831_s23, %s831_s23 }
 0x204   :  { %v251_v56 = vrot.slane %v237_v55, %v235_v51  ;;  %p996_p8 = scmp.ne.s32.totalorder %s831_s23, %s995_s24  ;;  %p1001_p10 = scmp.lt.s32.totalorder %s995_s24, %s995_s24 }
 0x206   :  { %286 = vxpose.xlu0.b32.start.end [1/1] (short) (narrow) %v251_v56, 8  ;;  %p1002_p11 = por %p1001_p10, %p1000_p9 }
 0x208   :  { %p1003_p12 = pnand %p1002_p11, %p996_p8 }
 0x20a   :  { %254 = vxpose.xlu0.b32.start.end [1/1] (short) (narrow) %v244_v57, 8 }
 0x286   :  { %v302_v10 = vpop.trf.xlu0 }
 0x287   :  { %v320_v11 = vadd.f32 %v318_v7, %v302_v10 }
 0x289   :  { %v845_v16 = vmul.f32 -1.442695, %v320_v11 }
 0x28a   :  { %v270_v17 = vpop.trf.xlu0 }
 0x28b   :  { %901 = vpow2.f32 %v845_v16  ;;  %v319_v22 = vadd.f32 %v318_v7, %v270_v17 }
 0x28d   :  { %v844_v23 = vmul.f32 -1.442695, %v319_v22 }
 0x28f   :  { %903 = vpow2.f32 %v844_v23 }
 0x295   :  { %v902_v24 = vpop.eup %901 }
 0x296   :  { %v328_v25 = vadd.f32 1.0, %v902_v24 }
 0x298   :  { %905 = vrcp.f32 %v328_v25 }
 0x299   :  { %v904_v26 = vpop.eup %903 }
 0x29a   :  { %v327_v27 = vadd.f32 1.0, %v904_v26 }
 0x29c   :  { %907 = vrcp.f32 %v327_v27 }
 0x2a2   :  { %v906_v28 = vpop.eup %905 }
 0x2a3   :  { %v334_v29 = vmul.f32 %v906_v28, %v320_v11 }
 0x2a5   :  { %371 = vxpose.xlu1.b32.start.end [1/1] (short) (narrow) %v334_v29, 8 }
 0x2a6   :  { %v908_v30 = vpop.eup %907 }
 0x2a7   :  { %v333_v31 = vmul.f32 %v908_v30, %v319_v22 }
 0x2a9   :  { %339 = vxpose.xlu0.b32.start.end [1/1] (short) (narrow) %v333_v31, 8 }
 0x325   :  { %v387_v32 = vpop.trf.xlu1 }
 0x326   :  { %v405_v33 = vrot.slane %v387_v32, 7 }
 0x329   :  { %v355_v34 = vpop.trf.xlu0 }
 0x32a   :  { %v406_v35 = vsel %vm151_vm2, %v405_v33, %v355_v34 }
 0x32b   :  { %880 = vmatmul.mubr.msk.f32.vlgmr.msra.gmra.mrb[0].mxu1 %vm407_vm3, %v406_v35 }
 0x3fe   :  { %v488_v36 = vpop.f32.mrb[0].mxu1 }
 0x3ff   :  { %v499_v37 = vrot.slane %v488_v36, %v235_v51  ;;  %v881_v38 = vpop.f32.mrb[1].mxu1 }
 0x401   :  { %v500_v39 = vcombine.high %v499_v37, %v499_v37  ;;  %v507_v40 = vrot.slane %v499_v37, %v235_v51 }
 0x403   :  { %517 = vxpose.xlu1.b32.start.end [1/1] (short) (narrow) %v507_v40, 32  ;;  %v514_v41 = vrot.slane %v500_v39, %v235_v51 }
 0x405   :  { %549 = vxpose.xlu0.b32.start.end [1/1] (short) (narrow) %v514_v41, 32 }
 0x421   :  { %899 = vset.pattern.permute.xlu1 %v1028_v42 }
 0x42e   :  { %900 = vset.pattern.permute.xlu0 %v1028_v42 }
 0x483   :  { %v533_v44 = vpop.trf.xlu1 }
 0x484   :  { %v585_v45 = vadd.f32 %v581_v43, %v533_v44 }
 0x485   :  { %v565_v46 = vpop.trf.xlu0 }
 0x486   :  { %v851_v48 = vmul.f32 -1.442695, %v585_v45  ;;  %v589_v49 = vadd.f32 %v581_v43, %v565_v46 }
 0x487   :  { %v534_v50 = vpop.trf.xlu1 }
 0x488   :  { %909 = vpow2.f32 %v851_v48  ;;  %v855_v51 = vmul.f32 -1.442695, %v589_v49  ;;  %v586_v52 = vadd.f32 %v582_v47, %v534_v50 }
 0x489   :  { %v566_v53 = vpop.trf.xlu0 }
 0x48a   :  { %911 = vpow2.f32 %v855_v51  ;;  %v852_v55 = vmul.f32 -1.442695, %v586_v52  ;;  %v590_v56 = vadd.f32 %v582_v47, %v566_v53 }
 0x48b   :  { %v535_v57 = vpop.trf.xlu1 }
 0x48c   :  { %913 = vpow2.f32 %v852_v55  ;;  %v856_v58 = vmul.f32 -1.442695, %v590_v56  ;;  %v587_v59 = vadd.f32 %v583_v54, %v535_v57 }
 0x48d   :  { %v567_v60 = vpop.trf.xlu0 }
 0x48e   :  { %915 = vpow2.f32 %v856_v58  ;;  %v853_v62 = vmul.f32 -1.442695, %v587_v59  ;;  %v591_v63 = vadd.f32 %v583_v54, %v567_v60 }
 0x48f   :  { %v536_v3 = vpop.trf.xlu1 }
 0x490   :  { %917 = vpow2.f32 %v853_v62  ;;  %v857_v7 = vmul.f32 -1.442695, %v591_v63  ;;  %v588_v10 = vadd.f32 %v584_v61, %v536_v3 }
 0x491   :  { %v568_v11 = vpop.trf.xlu0 }
 0x492   :  { %v910_v16 = vpop.eup %909  ;;  %919 = vpow2.f32 %v857_v7  ;;  %v854_v17 = vmul.f32 -1.442695, %v588_v10  ;;  %v592_v22 = vadd.f32 %v584_v61, %v568_v11 }
 0x493   :  { %v617_v23 = vadd.f32 1.0, %v910_v16 }
 0x494   :  { %v912_v24 = vpop.eup %911  ;;  %921 = vpow2.f32 %v854_v17  ;;  %v858_v25 = vmul.f32 -1.442695, %v592_v22 }
 0x495   :  { %923 = vrcp.f32 %v617_v23  ;;  %v621_v26 = vadd.f32 1.0, %v912_v24 }
 0x496   :  { %v914_v27 = vpop.eup %913  ;;  %925 = vpow2.f32 %v858_v25 }
 0x497   :  { %927 = vrcp.f32 %v621_v26  ;;  %v618_v28 = vadd.f32 1.0, %v914_v27 }
 0x498   :  { %v916_v29 = vpop.eup %915 }
 0x499   :  { %929 = vrcp.f32 %v618_v28  ;;  %v622_v30 = vadd.f32 1.0, %v916_v29 }
 0x49a   :  { %v918_v31 = vpop.eup %917 }
 0x49b   :  { %931 = vrcp.f32 %v622_v30  ;;  %v619_v32 = vadd.f32 1.0, %v918_v31 }
 0x49c   :  { %v920_v33 = vpop.eup %919 }
 0x49d   :  { %933 = vrcp.f32 %v619_v32  ;;  %v623_v34 = vadd.f32 1.0, %v920_v33 }
 0x49e   :  { %v922_v35 = vpop.eup %921 }
 0x49f   :  { %v1160_v36 = vpop.eup %923  ;;  %935 = vrcp.f32 %v623_v34  ;;  %v620_v37 = vadd.f32 1.0, %v922_v35 }
 0x4a0   :  { %v926_v38 = vpop.eup %925  ;;  %v641_v39 = vsub.f32 1.0, %v1160_v36  ;;  %v657_v43 = vmul.f32 %v1160_v36, %v1160_v36 }
 0x4a1   :  { %v1163_v40 = vpop.eup %927  ;;  %937 = vrcp.f32 %v620_v37  ;;  %v624_v41 = vadd.f32 1.0, %v926_v38 }
 0x4a2   :  { %v649_v42 = vmul.f32 %v641_v39, %v641_v39  ;;  %v645_v44 = vsub.f32 1.0, %v1163_v40  ;;  %v661_v45 = vmul.f32 %v1163_v40, %v1163_v40 }
 0x4a3   :  { %v1170_v46 = vpop.eup %929  ;;  %939 = vrcp.f32 %v624_v41 }
 0x4a4   :  { %v665_v47 = vadd.f32 %v657_v43, %v649_v42  ;;  %v653_v48 = vmul.f32 %v645_v44, %v645_v44  ;;  %v642_v49 = vsub.f32 1.0, %v1170_v46  ;;  %v658_v50 = vmul.f32 %v1170_v46, %v1170_v46 }
 0x4a5   :  { %v1175_v51 = vpop.eup %931 }
 0x4a6   :  { %v669_v52 = vadd.f32 %v661_v45, %v653_v48  ;;  %v650_v53 = vmul.f32 %v642_v49, %v642_v49  ;;  %v646_v54 = vsub.f32 1.0, %v1175_v51  ;;  %v662_v55 = vmul.f32 %v1175_v51, %v1175_v51 }
 0x4a7   :  { %v1180_v56 = vpop.eup %933  ;;  %941 = vrsqrt.f32 %v665_v47  ;;  %vm675_vm5 = vcmp.eq.f32.partialorder %v665_v47, inf  ;;  %vm677_vm6 = vcmp.eq.f32.partialorder %v665_v47, 0.0  ;;  %v678_v34 = vand.u32 2147483648, %v665_v47 }
 0x4a8   :  { %v666_v57 = vadd.f32 %v658_v50, %v650_v53  ;;  %v654_v58 = vmul.f32 %v646_v54, %v646_v54  ;;  %v643_v59 = vsub.f32 1.0, %v1180_v56  ;;  %v659_v60 = vmul.f32 %v1180_v56, %v1180_v56 }
 0x4a9   :  { %v1185_v61 = vpop.eup %935  ;;  %943 = vrsqrt.f32 %v669_v52  ;;  %vm703_vm7 = vcmp.eq.f32.partialorder %v669_v52, inf  ;;  %vm705_vm8 = vcmp.eq.f32.partialorder %v669_v52, 0.0  ;;  %v706_v41 = vand.u32 2147483648, %v669_v52 }
 0x4aa   :  { %v1187_v62 = vadd.f32 %v662_v55, %v654_v58  ;;  %v651_v63 = vmul.f32 %v643_v59, %v643_v59  ;;  %v647_v3 = vsub.f32 1.0, %v1185_v61  ;;  %v663_v7 = vmul.f32 %v1185_v61, %v1185_v61 }
 0x4ab   :  { %v1192_v10 = vpop.eup %937  ;;  %945 = vrsqrt.f32 %v666_v57  ;;  %vm682_vm9 = vcmp.eq.f32.partialorder %v666_v57, inf  ;;  %vm684_vm10 = vcmp.eq.f32.partialorder %v666_v57, 0.0  ;;  %v685_v44 = vand.u32 2147483648, %v666_v57 }
 0x4ac   :  { %v1194_v11 = vadd.f32 %v659_v60, %v651_v63  ;;  %v655_v16 = vmul.f32 %v647_v3, %v647_v3  ;;  %v644_v17 = vsub.f32 1.0, %v1192_v10  ;;  %v660_v22 = vmul.f32 %v1192_v10, %v1192_v10 }
 0x4ad   :  { %v1199_v23 = vpop.eup %939  ;;  %947 = vrsqrt.f32 %v1187_v62  ;;  %vm710_vm11 = vcmp.eq.f32.partialorder %v1187_v62, inf  ;;  %vm712_vm12 = vcmp.eq.f32.partialorder %v1187_v62, 0.0 }
 0x4ae   :  { %v1202_v24 = vadd.f32 %v663_v7, %v655_v16  ;;  %v652_v25 = vmul.f32 %v644_v17, %v644_v17  ;;  %v648_v26 = vsub.f32 1.0, %v1199_v23  ;;  %v664_v27 = vmul.f32 %v1199_v23, %v1199_v23 }
 0x4af   :  { %949 = vrsqrt.f32 %v1194_v11  ;;  %vm689_vm13 = vcmp.eq.f32.partialorder %v1194_v11, inf  ;;  %vm691_vm14 = vcmp.eq.f32.partialorder %v1194_v11, 0.0 }
 0x4b0   :  { %v1208_v28 = vadd.f32 %v660_v22, %v652_v25  ;;  %v656_v29 = vmul.f32 %v648_v26, %v648_v26  ;;  %951 = vrsqrt.f32 %v1202_v24  ;;  %vm717_vm15 = vcmp.eq.f32.partialorder %v1202_v24, inf }
 0x4b1   :  { %v942_v30 = vpop.eup %941  ;;  %vm719_vm0 = vcmp.eq.f32.partialorder %v1202_v24, 0.0  ;;  %v720_v22 = vand.u32 2147483648, %v1202_v24 }
 0x4b2   :  { %v1211_v31 = vadd.f32 %v664_v27, %v656_v29  ;;  %v674_v32 = vmul.f32 %v942_v30, %v665_v47  ;;  %953 = vrsqrt.f32 %v1208_v28  ;;  %vm696_vm1 = vcmp.eq.f32.partialorder %v1208_v28, inf }
 0x4b3   :  { %v944_v33 = vpop.eup %943  ;;  %vm698_vm2 = vcmp.eq.f32.partialorder %v1208_v28, 0.0 }
 0x4b4   :  { %v676_v35 = vsel %vm675_vm5, %v665_v47, %v674_v32  ;;  %v702_v37 = vmul.f32 %v944_v33, %v669_v52  ;;  %955 = vrsqrt.f32 %v1211_v31  ;;  %v713_v47 = vand.u32 2147483648, %v1187_v62 }
 0x4b5   :  { %v946_v38 = vpop.eup %945  ;;  %v679_v39 = vsel %vm677_vm6, %v678_v34, %v676_v35  ;;  %v699_v33 = vand.u32 2147483648, %v1208_v28  ;;  %vm724_vm3 = vcmp.eq.f32.partialorder %v1211_v31, inf  ;;  %vm726_vm4 = vcmp.eq.f32.partialorder %v1211_v31, 0.0 }
 0x4b6   :  { %v729_v42 = vmax.f32 %v679_v39, 1e-05  ;;  %v681_v43 = vmul.f32 %v946_v38, %v666_v57  ;;  %v704_v45 = vsel %vm703_vm7, %v669_v52, %v702_v37  ;;  %v692_v52 = vand.u32 2147483648, %v1194_v11 }
 0x4b7   :  { %v948_v48 = vpop.eup %947  ;;  %v707_v49 = vsel %vm705_vm8, %v706_v41, %v704_v45  ;;  %v727_v38 = vand.u32 2147483648, %v1211_v31 }
 0x4b8   :  { %957 = vrcp.f32 %v729_v42  ;;  %v683_v50 = vsel %vm682_vm9, %v666_v57, %v681_v43  ;;  %v733_v53 = vmax.f32 %v707_v49, 1e-05  ;;  %v709_v54 = vmul.f32 %v948_v48, %v1187_v62 }
 0x4b9   :  { %v950_v55 = vpop.eup %949  ;;  %v686_v58 = vsel %vm684_vm10, %v685_v44, %v683_v50 }
 0x4ba   :  { %v952_v59 = vpop.eup %951  ;;  %v730_v60 = vmax.f32 %v686_v58, 1e-05  ;;  %959 = vrcp.f32 %v733_v53  ;;  %v711_v63 = vsel %vm710_vm11, %v1187_v62, %v709_v54  ;;  %v688_v3 = vmul.f32 %v950_v55, %v1194_v11 }
 0x4bb   :  { %v714_v7 = vsel %vm712_vm12, %v713_v47, %v711_v63  ;;  %v716_v16 = vmul.f32 %v952_v59, %v1202_v24 }
 0x4bc   :  { %v954_v57 = vpop.eup %953  ;;  %961 = vrcp.f32 %v730_v60  ;;  %v734_v17 = vmax.f32 %v714_v7, 1e-05  ;;  %v690_v25 = vsel %vm689_vm13, %v1194_v11, %v688_v3 }
 0x4bd   :  { %v718_v26 = vsel %vm717_vm15, %v1202_v24, %v716_v16  ;;  %v693_v62 = vsel %vm691_vm14, %v692_v52, %v690_v25  ;;  %v695_v27 = vmul.f32 %v954_v57, %v1208_v28 }
 0x4be   :  { %v956_v29 = vpop.eup %955  ;;  %963 = vrcp.f32 %v734_v17  ;;  %v721_v30 = vsel %vm719_vm0, %v720_v22, %v718_v26  ;;  %v731_v32 = vmax.f32 %v693_v62, 1e-05 }
 0x4bf   :  { %v735_v34 = vmax.f32 %v721_v30, 1e-05  ;;  %v697_v35 = vsel %vm696_vm1, %v1208_v28, %v695_v27  ;;  %v723_v24 = vmul.f32 %v956_v29, %v1211_v31 }
 0x4c0   :  { %v700_v37 = vsel %vm698_vm2, %v699_v33, %v697_v35 }
 0x4c1   :  { %965 = vrcp.f32 %v735_v34  ;;  %v725_v11 = vsel %vm724_vm3, %v1211_v31, %v723_v24  ;;  %v732_v41 = vmax.f32 %v700_v37, 1e-05 }
 0x4c2   :  { %v958_v39 = vpop.eup %957  ;;  %967 = vrcp.f32 %v731_v32  ;;  %v728_v43 = vsel %vm726_vm4, %v727_v38, %v725_v11 }
 0x4c3   :  { %v738_v42 = vmul.f32 %v958_v39, %v1160_v36  ;;  %969 = vrcp.f32 %v732_v41  ;;  %v736_v45 = vmax.f32 %v728_v43, 1e-05 }
 0x4c4   :  { %v960_v44 = vpop.eup %959 }
 0x4c5   :  { %755 = vperm.xlu1 %899, %v738_v42   ;;  %v746_v49 = vmul.f32 %v960_v44, %v1163_v40  ;;  %971 = vrcp.f32 %v736_v45 }
 0x4c6   :  { %v962_v28 = vpop.eup %961 }
 0x4c7   :  { %v740_v48 = vmul.f32 %v962_v28, %v1170_v46 }
 0x4c8   :  { %v964_v47 = vpop.eup %963 }
 0x4c9   :  { %760 = vperm.xlu0 %900, %v740_v48   ;;  %775 = vperm.xlu1 %899, %v746_v49   ;;  %v748_v53 = vmul.f32 %v964_v47, %v1175_v51 }
 0x4cb   :  { %v966_v50 = vpop.eup %965 }
 0x4cc   :  { %v968_v31 = vpop.eup %967  ;;  %v750_v36 = vmul.f32 %v966_v50, %v1185_v61 }
 0x4cd   :  { %780 = vperm.xlu1 %899, %v748_v53   ;;  %v742_v54 = vmul.f32 %v968_v31, %v1180_v56  ;;  %v970_v55 = vpop.eup %969 }
 0x4ce   :  { %785 = vperm.xlu0 %900, %v750_v36   ;;  %v744_v46 = vmul.f32 %v970_v55, %v1192_v10 }
 0x4cf   :  { %v972_v58 = vpop.eup %971 }
 0x4d0   :  { %v752_v40 = vmul.f32 %v972_v58, %v1199_v23 }
 0x4d1   :  { %765 = vperm.xlu1 %899, %v742_v54  }
 0x4d5   :  { %770 = vperm.xlu1 %899, %v744_v46  }
 0x4d9   :  { %790 = vperm.xlu1 %899, %v752_v40  }
 0x544   :  { %v756_v52 = vpop.permute.xlu1 %755 }
 0x545   :  { %v793_v59 = vmul.f32 %v756_v52, %v1085_v5  ;;  %v794_v51 = vmul.f32 %v756_v52, %v1087_v6 }
 0x547   :  { %809 = vst [vmem:[#allocation5] sm:$0xff] %v793_v59  ;;  %810 = vst [vmem:[#allocation5 + $0x8] sm:$0xff] %v794_v51 }
 0x548   :  { %v776_v61 = vpop.permute.xlu1 %775  ;;  %v761_v60 = vpop.permute.xlu0 %760 }
 0x549   :  { %v801_v56 = vmul.f32 %v776_v61, %v1075_v0  ;;  %v802_v63 = vmul.f32 %v776_v61, %v1077_v1  ;;  %v795_v10 = vmul.f32 %v761_v60, %v1091_v8  ;;  %v796_v3 = vmul.f32 %v761_v60, %v1093_v9 }
 0x54b   :  { %817 = vst [vmem:[#allocation5 + $0x40] sm:$0xff] %v801_v56  ;;  %818 = vst [vmem:[#allocation5 + $0x48] sm:$0xff] %v802_v63 }
 0x54c   :  { %811 = vst [vmem:[#allocation5 + $0x10] sm:$0xff] %v795_v10  ;;  %812 = vst [vmem:[#allocation5 + $0x18] sm:$0xff] %v796_v3  ;;  %v781_v23 = vpop.permute.xlu1 %780 }
 0x54d   :  { %v803_v5 = vmul.f32 %v781_v23, %v1079_v2  ;;  %v804_v6 = vmul.f32 %v781_v23, %v1083_v4  ;;  %v786_v7 = vpop.permute.xlu0 %785 }
 0x54e   :  { %v805_v16 = vmul.f32 %v786_v7, %v1099_v12  ;;  %v806_v0 = vmul.f32 %v786_v7, %v1101_v13 }
 0x54f   :  { %819 = vst [vmem:[#allocation5 + $0x50] sm:$0xff] %v803_v5  ;;  %820 = vst [vmem:[#allocation5 + $0x58] sm:$0xff] %v804_v6 }
 0x550   :  { %821 = vst [vmem:[#allocation5 + $0x60] sm:$0xff] %v805_v16  ;;  %822 = vst [vmem:[#allocation5 + $0x68] sm:$0xff] %v806_v0  ;;  %v766_v1 = vpop.permute.xlu1 %765 }
 0x551   :  { %v797_v8 = vmul.f32 %v766_v1, %v1103_v14  ;;  %v798_v9 = vmul.f32 %v766_v1, %v1105_v15 }
 0x553   :  { %813 = vst [vmem:[#allocation5 + $0x20] sm:$0xff] %v797_v8  ;;  %814 = vst [vmem:[#allocation5 + $0x28] sm:$0xff] %v798_v9 }
 0x554   :  { %v771_v57 = vpop.permute.xlu1 %770 }
 0x555   :  { %v799_v2 = vmul.f32 %v771_v57, %v1115_v20  ;;  %v800_v4 = vmul.f32 %v771_v57, %v1117_v21 }
 0x557   :  { %815 = vst [vmem:[#allocation5 + $0x30] sm:$0xff] %v799_v2  ;;  %816 = vst [vmem:[#allocation5 + $0x38] sm:$0xff] %v800_v4 }
 0x558   :  { %v791_v12 = vpop.permute.xlu1 %790 }
 0x559   :  { %v807_v13 = vmul.f32 %v791_v12, %v1111_v18  ;;  %v808_v17 = vmul.f32 %v791_v12, %v1113_v19 }
 0x55b   :  { %823 = vst [vmem:[#allocation5 + $0x70] sm:$0xff] %v807_v13  ;;  %824 = vst [vmem:[#allocation5 + $0x78] sm:$0xff] %v808_v17 }
 0x55c   :  { %1006 = shalt.err (!%p1003_p12)
}
 0x55d   :  { %s1007_s27 = scalar_lea.hbm %s1291_s5, 2048 }
 0x55e   :  { %p1008_p13 = scmp.ne.s32.totalorder %s1291_s5, %s1007_s27  ;;  %p1011_p0 = scmp.lt.u32.totalorder %s1007_s27, %s1291_s5 }
 0x560   :  { %p1013_p1 = pnand %p1011_p0, %p1008_p13 }
 0x562   :  { %1016 = shalt.err (!%p1013_p1)
}
 0x563   :  { %836 = dma.vmem_to_hbm [thread:$0]  %s831_s23, 2048, %s1291_s5, [#allocation4], %s1022_s28, %s1022_s28, %s1023_s29  }
 0x564   :  { %1019 = dma.done.wait [#allocation4], 2048  }
 0x565   :  { %1020 = vsyncadd [#allocation4], 4294965248 }
 0x566   :  { %840 = vsyncpa [#allocation3], 1 }
 0x567   :  { %841 = vsyncpa [#allocation4], 1 }

</bundles_post_ra>
